<compile_context>
chip_gen: v5e
topology: v5e:2x2
jax: 0.10.0
libtpu: 0.0.40
codegen_flags: <defaults>
</compile_context>

<pallas_src>
import functools

import jax
import jax.numpy as jnp
from jax.experimental import pallas as pl
from jax.experimental.pallas import tpu as pltpu

SUBLANE = 8  # f32 vreg sublane height; batch tiles are multiples of this


def _round_up(n, m):
    return ((n + m - 1) // m) * m


def actor_mlp_kernel(x_ref,
                     w0_ref, b0_ref,
                     w1_ref, b1_ref,
                     w2_ref, b2_ref,
                     w3_ref, b3_ref,
                     o_ref,
                     *, max_action):
    """Fused MLP actor forward for one batch tile. All refs live in VMEM."""
    x = x_ref[...]
    dot = functools.partial(jnp.dot, preferred_element_type=jnp.float32)

    # layer 0: (obs+goal) -> first_dim, ReLU
    h = jnp.maximum(dot(x, w0_ref[...]) + b0_ref[...], 0.0)
    # hidden layer 1: first_dim -> hidden_dim, ReLU
    h = jnp.maximum(dot(h, w1_ref[...]) + b1_ref[...], 0.0)
    # hidden layer 2: hidden_dim -> hidden_dim, ReLU
    h = jnp.maximum(dot(h, w2_ref[...]) + b2_ref[...], 0.0)
    # output layer: hidden_dim -> action_dim
    y = dot(h, w3_ref[...]) + b3_ref[...]

    # actor head: max_action * tanh(.)  (tanh on EUP, scale on VPU)
    o_ref[...] = (max_action * jnp.tanh(y)).astype(o_ref.dtype)


def _choose_batch_tile(batch, batch_tile):
    """Tile rows: multiple of 8, capped at batch_tile, even tile count when >1."""
    if batch <= batch_tile:
        return _round_up(batch, SUBLANE)
    n_tiles = pl.cdiv(batch, batch_tile)
    if n_tiles % 2:  # balance the grid across 2 TensorCores (v7x megacore)
        n_tiles += 1
    return _round_up(pl.cdiv(batch, n_tiles), SUBLANE)


def actor_forward(x, params, max_action, *, batch_tile=512):
    """x: [batch, obs+goal] f32. params: list of (W[in,out], b[1,out]) for 4 layers."""
    batch, in_dim = x.shape
    action_dim = params[-1][0].shape[1]

    tb = _choose_batch_tile(batch, batch_tile)
    batch_p = _round_up(batch, tb)
    # Only wrapper op on the hot path: pad batch rows when not tile-aligned.
    x_p = x if batch_p == batch else jnp.pad(x, ((0, batch_p - batch), (0, 0)))

    grid = (batch_p // tb,)

    # x: tiled over batch; last dim = full array dim (16), so no lane padding.
    in_specs = [pl.BlockSpec((tb, in_dim), lambda i: (i, 0))]
    flat_args = [x_p]
    for w, b in params:
        b2 = b.reshape(1, -1)
        # weights/biases: same (full-array) block every grid step -> VMEM-resident
        in_specs.append(pl.BlockSpec(w.shape, lambda i: (0, 0)))
        in_specs.append(pl.BlockSpec(b2.shape, lambda i: (0, 0)))
        flat_args.append(w)
        flat_args.append(b2)

    out_p = pl.pallas_call(
        functools.partial(actor_mlp_kernel, max_action=max_action),
        out_shape=jax.ShapeDtypeStruct((batch_p, action_dim), jnp.float32),
        grid=grid,
        in_specs=in_specs,
        out_specs=pl.BlockSpec((tb, action_dim), lambda i: (i, 0)),
        compiler_params=pltpu.CompilerParams(
            dimension_semantics=("parallel",)),
    )(*flat_args)

    # drop the padded batch rows (no lane slicing needed anymore)
    return out_p if batch_p == batch else out_p[:batch]


def init_linear(key, fan_in, fan_out):
    """Deterministic init mimicking PyTorch's default Linear init."""
    kw, kb = jax.random.split(key)
    bound = 1.0 / jnp.sqrt(jnp.float32(fan_in))
    w = jax.random.uniform(kw, (fan_in, fan_out), jnp.float32, -bound, bound)
    b = jax.random.uniform(kb, (1, fan_out), jnp.float32, -bound, bound)
    return w, b


def reference_forward(x, params, max_action):
    h = x
    for i, (w, b) in enumerate(params):
        h = h @ w + b
        if i < len(params) - 1:
            h = jnp.maximum(h, 0.0)
    return max_action * jnp.tanh(h)


if __name__ == "__main__":
    # Small, module-consistent shapes:
    #   env_params: obs=13, goal=3 -> input 16;  action=4;  action_max=1.0
    #   args: n_hidden=2, hidden_dim=32, first_dim=64, network_class='MLP'
    obs_dim, goal_dim, action_dim = 13, 3, 4
    in_dim = obs_dim + goal_dim
    first_dim, hidden_dim = 64, 32
    max_action = 1.0

    key = jax.random.PRNGKey(0)
    k_x, k_x2, k0, k1, k2, k3 = jax.random.split(key, 6)

    params = [
        init_linear(k0, in_dim, first_dim),
        init_linear(k1, first_dim, hidden_dim),
        init_linear(k2, hidden_dim, hidden_dim),
        init_linear(k3, hidden_dim, action_dim),
    ]

    # jit the wrapper so the (rare) pad/slice ops fuse into one dispatch per shape
    fwd = jax.jit(lambda xx, pp: actor_forward(xx, pp, max_action))

    # --- small batch (per-env-step inference shape) ---
    batch = 8
    x = jax.random.normal(k_x, (batch, in_dim), jnp.float32)
    out = jax.block_until_ready(fwd(x, params))
    ref = reference_forward(x, params, max_action)
    assert out.shape == (batch, action_dim)
    assert jnp.allclose(out, ref, atol=1e-5, rtol=1e-5), "mismatch vs. JAX reference (small batch)"

    # --- larger batch exercising the batch grid (2 balanced tiles of 304 rows) ---
    batch2 = 600
    x2 = jax.random.normal(k_x2, (batch2, in_dim), jnp.float32)
    out2 = jax.block_until_ready(fwd(x2, params))
    ref2 = reference_forward(x2, params, max_action)
    assert out2.shape == (batch2, action_dim)
    assert jnp.allclose(out2, ref2, atol=1e-5, rtol=1e-5), "mismatch vs. JAX reference (large batch)"

    print("KERNEL_OK")
</pallas_src>

<mosaic_0001>
module attributes {stable_mosaic.version = 11 : i64} {
  func.func @actor_mlp_kernel(%arg0: i32, %arg1: memref<8x16xf32, #tpu.memory_space<vmem>>, %arg2: memref<16x64xf32, #tpu.memory_space<vmem>>, %arg3: memref<1x64xf32, #tpu.memory_space<vmem>>, %arg4: memref<64x32xf32, #tpu.memory_space<vmem>>, %arg5: memref<1x32xf32, #tpu.memory_space<vmem>>, %arg6: memref<32x32xf32, #tpu.memory_space<vmem>>, %arg7: memref<1x32xf32, #tpu.memory_space<vmem>>, %arg8: memref<32x4xf32, #tpu.memory_space<vmem>>, %arg9: memref<1x4xf32, #tpu.memory_space<vmem>>, %arg10: memref<8x4xf32, #tpu.memory_space<vmem>>) attributes {dimension_semantics = [#tpu.dimension_semantics<parallel>], iteration_bounds = array<i64: 1>, scalar_prefetch = 0 : i64, scratch_operands = 0 : i64, tpu.core_type = #tpu.core_type<tc>, window_params = [{transform_indices = @transform_0, window_bounds = array<i64: 8, 16>}, {pipeline_mode = #tpu.pipeline_mode<synchronous>, transform_indices = @transform_1, window_bounds = array<i64: 16, 64>}, {pipeline_mode = #tpu.pipeline_mode<synchronous>, transform_indices = @transform_2, window_bounds = array<i64: 1, 64>}, {pipeline_mode = #tpu.pipeline_mode<synchronous>, transform_indices = @transform_3, window_bounds = array<i64: 64, 32>}, {pipeline_mode = #tpu.pipeline_mode<synchronous>, transform_indices = @transform_4, window_bounds = array<i64: 1, 32>}, {pipeline_mode = #tpu.pipeline_mode<synchronous>, transform_indices = @transform_5, window_bounds = array<i64: 32, 32>}, {pipeline_mode = #tpu.pipeline_mode<synchronous>, transform_indices = @transform_6, window_bounds = array<i64: 1, 32>}, {pipeline_mode = #tpu.pipeline_mode<synchronous>, transform_indices = @transform_7, window_bounds = array<i64: 32, 4>}, {pipeline_mode = #tpu.pipeline_mode<synchronous>, transform_indices = @transform_8, window_bounds = array<i64: 1, 4>}, {transform_indices = @transform_9, window_bounds = array<i64: 8, 4>}]} {
    %c0 = arith.constant 0 : index
    %c0_0 = arith.constant 0 : index
    %0 = vector.load %arg1[%c0, %c0_0] : memref<8x16xf32, #tpu.memory_space<vmem>>, vector<8x16xf32>
    %c0_1 = arith.constant 0 : index
    %c0_2 = arith.constant 0 : index
    %1 = vector.load %arg2[%c0_1, %c0_2] : memref<16x64xf32, #tpu.memory_space<vmem>>, vector<16x64xf32>
    %cst = arith.constant dense<0.000000e+00> : vector<8x64xf32>
    %2 = tpu.matmul %0, %1, %cst {dimension_numbers = #tpu.dot_dimension_numbers<[1], [0], [0], [1], [0, 0, 1, 1], [], []>} : vector<8x16xf32>, vector<16x64xf32>, vector<8x64xf32> -> vector<8x64xf32>
    %c0_3 = arith.constant 0 : index
    %c0_4 = arith.constant 0 : index
    %3 = vector.load %arg3[%c0_3, %c0_4] : memref<1x64xf32, #tpu.memory_space<vmem>>, vector<1x64xf32>
    %4 = vector.broadcast %3 : vector<1x64xf32> to vector<8x64xf32>
    %5 = arith.addf %2, %4 : vector<8x64xf32>
    %cst_5 = arith.constant 0.000000e+00 : f32
    %6 = vector.broadcast %cst_5 : f32 to vector<8x64xf32>
    %7 = arith.maximumf %5, %6 : vector<8x64xf32>
    %c0_6 = arith.constant 0 : index
    %c0_7 = arith.constant 0 : index
    %8 = vector.load %arg4[%c0_6, %c0_7] : memref<64x32xf32, #tpu.memory_space<vmem>>, vector<64x32xf32>
    %cst_8 = arith.constant dense<0.000000e+00> : vector<8x32xf32>
    %9 = tpu.matmul %7, %8, %cst_8 {dimension_numbers = #tpu.dot_dimension_numbers<[1], [0], [0], [1], [0, 0, 1, 1], [], []>} : vector<8x64xf32>, vector<64x32xf32>, vector<8x32xf32> -> vector<8x32xf32>
    %c0_9 = arith.constant 0 : index
    %c0_10 = arith.constant 0 : index
    %10 = vector.load %arg5[%c0_9, %c0_10] : memref<1x32xf32, #tpu.memory_space<vmem>>, vector<1x32xf32>
    %11 = vector.broadcast %10 : vector<1x32xf32> to vector<8x32xf32>
    %12 = arith.addf %9, %11 : vector<8x32xf32>
    %cst_11 = arith.constant 0.000000e+00 : f32
    %13 = vector.broadcast %cst_11 : f32 to vector<8x32xf32>
    %14 = arith.maximumf %12, %13 : vector<8x32xf32>
    %c0_12 = arith.constant 0 : index
    %c0_13 = arith.constant 0 : index
    %15 = vector.load %arg6[%c0_12, %c0_13] : memref<32x32xf32, #tpu.memory_space<vmem>>, vector<32x32xf32>
    %cst_14 = arith.constant dense<0.000000e+00> : vector<8x32xf32>
    %16 = tpu.matmul %14, %15, %cst_14 {dimension_numbers = #tpu.dot_dimension_numbers<[1], [0], [0], [1], [0, 0, 1, 1], [], []>} : vector<8x32xf32>, vector<32x32xf32>, vector<8x32xf32> -> vector<8x32xf32>
    %c0_15 = arith.constant 0 : index
    %c0_16 = arith.constant 0 : index
    %17 = vector.load %arg7[%c0_15, %c0_16] : memref<1x32xf32, #tpu.memory_space<vmem>>, vector<1x32xf32>
    %18 = vector.broadcast %17 : vector<1x32xf32> to vector<8x32xf32>
    %19 = arith.addf %16, %18 : vector<8x32xf32>
    %cst_17 = arith.constant 0.000000e+00 : f32
    %20 = vector.broadcast %cst_17 : f32 to vector<8x32xf32>
    %21 = arith.maximumf %19, %20 : vector<8x32xf32>
    %c0_18 = arith.constant 0 : index
    %c0_19 = arith.constant 0 : index
    %22 = vector.load %arg8[%c0_18, %c0_19] : memref<32x4xf32, #tpu.memory_space<vmem>>, vector<32x4xf32>
    %cst_20 = arith.constant dense<0.000000e+00> : vector<8x4xf32>
    %23 = tpu.matmul %21, %22, %cst_20 {dimension_numbers = #tpu.dot_dimension_numbers<[1], [0], [0], [1], [0, 0, 1, 1], [], []>} : vector<8x32xf32>, vector<32x4xf32>, vector<8x4xf32> -> vector<8x4xf32>
    %c0_21 = arith.constant 0 : index
    %c0_22 = arith.constant 0 : index
    %24 = vector.load %arg9[%c0_21, %c0_22] : memref<1x4xf32, #tpu.memory_space<vmem>>, vector<1x4xf32>
    %25 = vector.broadcast %24 : vector<1x4xf32> to vector<8x4xf32>
    %26 = arith.addf %23, %25 : vector<8x4xf32>
    %27 = math.tanh %26 : vector<8x4xf32>
    %cst_23 = arith.constant 1.000000e+00 : f32
    %28 = vector.broadcast %cst_23 : f32 to vector<8x4xf32>
    %29 = arith.mulf %28, %27 : vector<8x4xf32>
    %c0_24 = arith.constant 0 : index
    %c0_25 = arith.constant 0 : index
    %30 = vector.load %arg10[%c0_24, %c0_25] : memref<8x4xf32, #tpu.memory_space<vmem>>, vector<8x4xf32>
    tpu.vector_store %arg10[%c0_24, %c0_25], %29 {strides = array<i32>} : memref<8x4xf32, #tpu.memory_space<vmem>>, vector<8x4xf32>,
    return
  }
  func.func @transform_0(%arg0: i32) -> (i32, i32) {
    %c0_i32 = arith.constant 0 : i32
    %c0_i32_0 = arith.constant 0 : i32
    return %arg0, %c0_i32 : i32, i32
  }
  func.func @transform_1(%arg0: i32) -> (i32, i32) {
    %c0_i32 = arith.constant 0 : i32
    %c0_i32_0 = arith.constant 0 : i32
    %c0_i32_1 = arith.constant 0 : i32
    return %c0_i32, %c0_i32_0 : i32, i32
  }
  func.func @transform_2(%arg0: i32) -> (i32, i32) {
    %c0_i32 = arith.constant 0 : i32
    %c0_i32_0 = arith.constant 0 : i32
    %c0_i32_1 = arith.constant 0 : i32
    return %c0_i32, %c0_i32_0 : i32, i32
  }
  func.func @transform_3(%arg0: i32) -> (i32, i32) {
    %c0_i32 = arith.constant 0 : i32
    %c0_i32_0 = arith.constant 0 : i32
    %c0_i32_1 = arith.constant 0 : i32
    return %c0_i32, %c0_i32_0 : i32, i32
  }
  func.func @transform_4(%arg0: i32) -> (i32, i32) {
    %c0_i32 = arith.constant 0 : i32
    %c0_i32_0 = arith.constant 0 : i32
    %c0_i32_1 = arith.constant 0 : i32
    return %c0_i32, %c0_i32_0 : i32, i32
  }
  func.func @transform_5(%arg0: i32) -> (i32, i32) {
    %c0_i32 = arith.constant 0 : i32
    %c0_i32_0 = arith.constant 0 : i32
    %c0_i32_1 = arith.constant 0 : i32
    return %c0_i32, %c0_i32_0 : i32, i32
  }
  func.func @transform_6(%arg0: i32) -> (i32, i32) {
    %c0_i32 = arith.constant 0 : i32
    %c0_i32_0 = arith.constant 0 : i32
    %c0_i32_1 = arith.constant 0 : i32
    return %c0_i32, %c0_i32_0 : i32, i32
  }
  func.func @transform_7(%arg0: i32) -> (i32, i32) {
    %c0_i32 = arith.constant 0 : i32
    %c0_i32_0 = arith.constant 0 : i32
    %c0_i32_1 = arith.constant 0 : i32
    return %c0_i32, %c0_i32_0 : i32, i32
  }
  func.func @transform_8(%arg0: i32) -> (i32, i32) {
    %c0_i32 = arith.constant 0 : i32
    %c0_i32_0 = arith.constant 0 : i32
    %c0_i32_1 = arith.constant 0 : i32
    return %c0_i32, %c0_i32_0 : i32, i32
  }
  func.func @transform_9(%arg0: i32) -> (i32, i32) {
    %c0_i32 = arith.constant 0 : i32
    %c0_i32_0 = arith.constant 0 : i32
    return %arg0, %c0_i32 : i32, i32
  }
}

</mosaic_0001>

<bundles_post_ra>
// kernel: _lambda_.1
= control target key start
LH: loop header
LB: loop body
LE: loop exit
PB: predicated region body
PF: predicated region fallthrough
CT: control target
= control target key end

     0   :  { %vm39_vm0 = vcmask 130048   ;;  %vm76_vm1 = vcmask 523264   ;;  %vm109_vm2 = vcmask 261120   ;;  %vm166_vm3 = vcmask 31744   ;;  %s304_s1 = inlined_call_operand.vmem [shape: f32[16,64], index: 1, kind: input, shape index: {}]   ;;  %s305_s0 = inlined_call_operand.vmem [shape: f32[8,16], index: 0, kind: input, shape index: {}]   ;;  %s306_s3 = inlined_call_operand.vmem [shape: f32[64,32], index: 3, kind: input, shape index: {}]   ;;  %s307_s2 = inlined_call_operand.vmem [shape: f32[1,64], index: 2, kind: input, shape index: {}]   ;;  %s308_s4 = inlined_call_operand.vmem [shape: f32[1,32], index: 4, kind: input, shape index: {}]   ;;  %s309_s5 = inlined_call_operand.vmem [shape: f32[32,32], index: 5, kind: input, shape index: {}]   ;;  %s310_s6 = inlined_call_operand.vmem [shape: f32[1,32], index: 6, kind: input, shape index: {}]   ;;  %s311_s7 = inlined_call_operand.vmem [shape: f32[32,4], index: 7, kind: input, shape index: {}]   ;;  %s312_s8 = inlined_call_operand.vmem [shape: f32[1,4], index: 8, kind: input, shape index: {}]   ;;  %s313_s9 = inlined_call_operand.vmem [shape: f32[8,4], index: 9, kind: output, shape index: {}]  }
   0x1   :  { %v34_v0 = vld [vmem:[%s304_s1 + $0x8] sm:$0xff]  ;;  %v33_v1 = vld [vmem:[%s304_s1] sm:$0xff]  ;;  %v71_v3 = vld [vmem:[%s306_s3 + $0x38] sm:$0xff] }
   0x2   :  { %57 = vmatpush.msra.mxu0 %v34_v0  ;;  %v32_v2 = vld [vmem:[%s305_s0] sm:$0xff]  ;;  %v70_v4 = vld [vmem:[%s306_s3 + $0x30] sm:$0xff]  ;;  %88 = vmatpush.msra.mxu1 %v71_v3  ;;  %v69_v5 = vld [vmem:[%s306_s3 + $0x28] sm:$0xff] }
   0x3   :  { %v68_v6 = vld [vmem:[%s306_s3 + $0x20] sm:$0xff]  ;;  %v67_v7 = vld [vmem:[%s306_s3 + $0x18] sm:$0xff]  ;;  %v66_v8 = vld [vmem:[%s306_s3 + $0x10] sm:$0xff] }
   0x4   :  { %58 = vmatpush.msra.mxu0 %v33_v1  ;;  %89 = vmatpush.msra.mxu1 %v70_v4  ;;  %v65_v9 = vld [vmem:[%s306_s3 + $0x8] sm:$0xff]  ;;  %v64_v10 = vld [vmem:[%s306_s3] sm:$0xff]  ;;  %v104_v11 = vld [vmem:[%s309_s5 + $0x18] sm:$0xff] }
   0x5   :  { %172 = vmatmul.msk.f32.vlgmr.msra.gmra.mxu0 %vm39_vm0, %v32_v2  ;;  %125 = vmatpush.msra.mxu2 %v104_v11  ;;  %v176_v12 = vld [vmem:[%s307_s2] ss:$0 sm:$0xff]  ;;  %v103_v16 = vld [vmem:[%s309_s5 + $0x10] sm:$0xff]  ;;  %v102_v17 = vld [vmem:[%s309_s5 + $0x8] sm:$0xff] }
   0x6   :  { %90 = vmatpush.msra.mxu1 %v69_v5  ;;  %v101_v18 = vld [vmem:[%s309_s5] sm:$0xff]  ;;  %v137_v19 = vld [vmem:[%s311_s7 + $0x18] sm:$0xff]  ;;  %v136_v24 = vld [vmem:[%s311_s7 + $0x10] sm:$0xff] }
   0x7   :  { %126 = vmatpush.msra.mxu2 %v103_v16  ;;  %157 = vmatpush.msra.mxu3 %v137_v19  ;;  %v177_v20 = vld [vmem:[%s308_s4] ss:$0 sm:$0xff]  ;;  %v135_v25 = vld [vmem:[%s311_s7 + $0x8] sm:$0xff] }
   0x8   :  { %91 = vmatpush.msra.mxu1 %v68_v6  ;;  %v134_v26 = vld [vmem:[%s311_s7] sm:$0xff] }
   0x9   :  { %127 = vmatpush.msra.mxu2 %v102_v17  ;;  %158 = vmatpush.msra.mxu3 %v136_v24  ;;  %v178_v27 = vld [vmem:[%s310_s6] ss:$0 sm:$0xff] }
   0xa   :  { %92 = vmatpush.msra.mxu1 %v67_v7  ;;  %v179_v31 = vld [vmem:[%s312_s8] ss:$0 sm:$0xff] }
   0xb   :  { %128 = vmatpush.msra.mxu2 %v101_v18  ;;  %159 = vmatpush.msra.mxu3 %v135_v25 }
   0xc   :  { %93 = vmatpush.msra.mxu1 %v66_v8 }
   0xd   :  { %160 = vmatpush.msra.mxu3 %v134_v26 }
   0xe   :  { %94 = vmatpush.msra.mxu1 %v65_v9 }
  0x10   :  { %95 = vmatpush.msra.mxu1 %v64_v10 }
  0x82   :  { %v60_v13 = vpop.f32.mrf.mxu0 }
  0x83   :  { %v61_v14 = vadd.f32 %v176_v12, %v60_v13 }
  0x85   :  { %v63_v15 = vmax.f32 %v61_v14, 0.0 }
  0x87   :  { %173 = vmatmul.msk.f32.vlgmr.msra.gmra.mxu1 %vm76_vm1, %v63_v15 }
 0x104   :  { %v97_v21 = vpop.f32.mrf.mxu1 }
 0x105   :  { %v98_v22 = vadd.f32 %v177_v20, %v97_v21 }
 0x107   :  { %v100_v23 = vmax.f32 %v98_v22, 0.0 }
 0x109   :  { %174 = vmatmul.msk.f32.vlgmr.msra.gmra.mxu2 %vm109_vm2, %v100_v23 }
 0x18c   :  { %v130_v28 = vpop.f32.mrf.mxu2 }
 0x18d   :  { %v131_v29 = vadd.f32 %v178_v27, %v130_v28 }
 0x18f   :  { %v133_v30 = vmax.f32 %v131_v29, 0.0 }
 0x191   :  { %175 = vmatmul.msk.f32.vlgmr.msra.gmra.mxu3 %vm109_vm2, %v133_v30 }
 0x214   :  { %v162_v32 = vpop.f32.mrf.mxu3 }
 0x215   :  { %v163_v33 = vadd.f32 %v179_v31, %v162_v32 }
 0x217   :  { %180 = vtanh.f32 %v163_v33 }
 0x21d   :  { %v181_v34 = vpop.eup %180 }
 0x21e   :  { %167 = vst.msk [vmem:[%s313_s9] sm:$0xff] %vm166_vm3, %v181_v34 }

</bundles_post_ra>
